<compile_context>
chip_gen: v7x
topology: tpu7x:2x2x1
jax: 0.10.0
libtpu: 0.0.40
codegen_flags: <defaults>
</compile_context>

<pallas_src>
import math

import jax
import jax.numpy as jnp
from jax import lax
from jax.experimental import pallas as pl
from jax.experimental.pallas import tpu as pltpu


_INV_SQRT2 = 1.0 / math.sqrt(2.0)


def _gelu_exact(x):
    # Matches torch.nn.functional.gelu default (erf-based, not tanh approx).
    return 0.5 * x * (1.0 + lax.erf(x * _INV_SQRT2))


# -----------------------------------------------------------------------------
# Kernel
# -----------------------------------------------------------------------------
def make_gru_decoder_kernel(depth, hidden_dim, aud_dim, lxm_dim, ln_eps=1e-5):
    H = hidden_dim
    AL = aud_dim + lxm_dim          # width of cat([aud, lxm])
    in0 = H + AL                    # layer-0 GRU input width: [in_embed | aud | lxm]

    def kernel(x_in_ref,            # [N, AL]           cat([aud, lxm])
               h0_ref,              # [P, N, H]          (aliased with state output)
               w_in_ref,            # [AL, H]            embed_in weight (transposed)
               w_big_ref,           # [P, in0+H, 3H]     fused gate weights (see header)
               w_hn_ref,            # [P, H, H]          n-gate hidden weights
               bias_ref,            # [1+4P, H]          b_in, then per layer b_r,b_z,bin_n,bhn_n
               w_pred_ref,          # [H, out]           LayerNorm gamma folded in
               b_pred_ref,          # [1, out]           LayerNorm beta folded in
               out_ref,             # [N, out]
               state_ref):          # [P, N, H]          aliases h0_ref's HBM buffer
        x_in = x_in_ref[...]
        biases = bias_ref[...]

        # --- in_embed = gelu(Linear(cat([aud, lxm]))) -------------------------
        in_embed = _gelu_exact(
            jnp.dot(x_in, w_in_ref[...], preferred_element_type=jnp.float32)
            + biases[0:1, :])

        # --- GRU, one time step, `depth` layers (PyTorch gate order r, z, n) --
        # Two matmuls per layer on the serial chain (see file header).
        x = jnp.concatenate([in_embed, x_in], axis=-1)    # [N, in0]
        for l in range(depth):
            h_prev = h0_ref[l]      # read BEFORE writing state_ref[l] (alias safety)

            b_r = biases[1 + 4 * l: 2 + 4 * l, :]
            b_z = biases[2 + 4 * l: 3 + 4 * l, :]
            b_in_n = biases[3 + 4 * l: 4 + 4 * l, :]
            b_hn = biases[4 + 4 * l: 5 + 4 * l, :]

            rows = (in0 if l == 0 else H) + H
            xh = jnp.concatenate([x, h_prev], axis=-1)    # [N, rows]  (XLU lane concat)
            big = jnp.dot(xh, w_big_ref[l][0:rows, :],
                          preferred_element_type=jnp.float32)        # [N, 3H]
            gh_n = jnp.dot(h_prev, w_hn_ref[l],
                           preferred_element_type=jnp.float32)       # [N, H]

            r = jax.nn.sigmoid(big[:, 0:H] + b_r)
            z = jax.nn.sigmoid(big[:, H:2 * H] + b_z)
            n = jnp.tanh(big[:, 2 * H:3 * H] + b_in_n + r * (gh_n + b_hn))
            h_new = (1.0 - z) * n + z * h_prev

            state_ref[l] = h_new
            x = h_new

        # --- LayerNorm (affine folded into the prediction head) ---------------
        mean = jnp.mean(x, axis=-1, keepdims=True)
        var = jnp.mean(jnp.square(x - mean), axis=-1, keepdims=True)
        xn = (x - mean) * lax.rsqrt(var + ln_eps)

        # --- embed_pred linear (gamma/beta folded in) --------------------------
        out_ref[...] = (
            jnp.dot(xn, w_pred_ref[...], preferred_element_type=jnp.float32)
            + b_pred_ref[...])

    return kernel


# -----------------------------------------------------------------------------
# Wrapper: consolidate / fold parameters into 8 VMEM operands, call the kernel
# -----------------------------------------------------------------------------
def _prepare_kernel_inputs(aud, lxm, cell_state, params, depth, hidden_dim):
    H = hidden_dim
    A = aud.shape[1]
    L = lxm.shape[1]
    in0 = H + A + L                 # layer-0 GRU input width
    maxrows = in0 + H               # row count of the fused big weight (layer 0)

    x_in = jnp.concatenate([aud, lxm], axis=-1)          # [N, A+L]

    w_big_layers, w_hn_layers = [], []
    bias_rows = [params["b_in"]]                          # row 0: embed_in bias
    for l in range(depth):
        wih = params[f"wih_{l}"]    # [in_l, 3H]  (transposed PyTorch weight_ih)
        whh = params[f"whh_{l}"]    # [H, 3H]
        bih = params[f"bih_{l}"]    # [1, 3H]
        bhh = params[f"bhh_{l}"]    # [1, 3H]

        # hidden rows contribute to r/z only; n-column block is zero (gh_n separate)
        whh_rz0 = jnp.concatenate(
            [whh[:, :2 * H], jnp.zeros((H, H), jnp.float32)], axis=-1)   # [H, 3H]
        big = jnp.concatenate([wih, whh_rz0], axis=0)                    # [in_l+H, 3H]
        pad = maxrows - big.shape[0]
        if pad:
            big = jnp.concatenate(
                [big, jnp.zeros((pad, 3 * H), jnp.float32)], axis=0)
        w_big_layers.append(big)
        w_hn_layers.append(whh[:, 2 * H:])                               # [H, H]

        bias_rows += [bih[:, :H] + bhh[:, :H],            # b_r (input+hidden folded)
                      bih[:, H:2 * H] + bhh[:, H:2 * H],  # b_z (input+hidden folded)
                      bih[:, 2 * H:],                     # b_in_n
                      bhh[:, 2 * H:]]                     # b_hn

    w_big = jnp.stack(w_big_layers, axis=0)               # [P, maxrows, 3H]
    w_hn = jnp.stack(w_hn_layers, axis=0)                 # [P, H, H]
    bias_h = jnp.concatenate(bias_rows, axis=0)           # [1+4P, H]

    # Fold LayerNorm affine into the prediction head:
    #   (xn * gamma + beta) @ W + b == xn @ (diag(gamma) W) + (beta @ W + b)
    gamma = params["gamma"]                               # [1, H]
    beta = params["beta"]                                 # [1, H]
    w_pred = gamma.reshape(H, 1) * params["w_pred"]
    b_pred = beta @ params["w_pred"] + params["b_pred"]

    return [x_in, cell_state, params["w_in"], w_big, w_hn, bias_h, w_pred, b_pred]


def gru_decoder_forward(aud, lxm, cell_state, params, *, depth, hidden_dim, out_dim):
    N, A = aud.shape
    L = lxm.shape[1]
    H = hidden_dim
    AL = A + L

    inputs = _prepare_kernel_inputs(aud, lxm, cell_state, params, depth, hidden_dim)

    # Advisory cost estimate so XLA schedules around this tiny custom call.
    flops = 2 * N * (AL * H)                              # embed_in
    for l in range(depth):
        in_l = (H + AL) if l == 0 else H
        flops += 2 * N * ((in_l + H) * 3 * H + H * H)     # fused big + gh_n
    flops += 2 * N * (H * out_dim)                        # pred head
    transcendentals = N * (H + 3 * H * depth + 1)
    bytes_accessed = (sum(int(x.size) for x in inputs)
                      + N * out_dim + int(cell_state.size)) * 4
    cost = pl.CostEstimate(flops=flops, transcendentals=transcendentals,
                           bytes_accessed=bytes_accessed)

    vmem_spec = pl.BlockSpec(memory_space=pltpu.MemorySpace.VMEM)
    out_shape = (
        jax.ShapeDtypeStruct((N, out_dim), jnp.float32),
        jax.ShapeDtypeStruct(cell_state.shape, jnp.float32),
    )
    return pl.pallas_call(
        make_gru_decoder_kernel(depth, hidden_dim, A, L),
        out_shape=out_shape,
        in_specs=[vmem_spec] * len(inputs),
        out_specs=(vmem_spec, vmem_spec),
        # New state reuses the cell_state buffer (input index 1 -> output index 1).
        input_output_aliases={1: 1},
        cost_estimate=cost,
    )(*inputs)


# -----------------------------------------------------------------------------
# Pure-JAX reference (mirrors the PyTorch forward)
# -----------------------------------------------------------------------------
def reference_forward(aud, lxm, cell_state, params, *, depth, hidden_dim):
    H = hidden_dim
    x_cat = jnp.concatenate([aud, lxm], axis=-1)
    in_embed = jax.nn.gelu(x_cat @ params["w_in"] + params["b_in"], approximate=False)
    x = jnp.concatenate([in_embed, aud, lxm], axis=-1)
    new_state = []
    for l in range(depth):
        h_prev = cell_state[l]
        gi = x @ params[f"wih_{l}"] + params[f"bih_{l}"]
        gh = h_prev @ params[f"whh_{l}"] + params[f"bhh_{l}"]
        r = jax.nn.sigmoid(gi[:, :H] + gh[:, :H])
        z = jax.nn.sigmoid(gi[:, H:2 * H] + gh[:, H:2 * H])
        n = jnp.tanh(gi[:, 2 * H:] + r * gh[:, 2 * H:])
        h_new = (1.0 - z) * n + z * h_prev
        new_state.append(h_new)
        x = h_new
    mean = jnp.mean(x, axis=-1, keepdims=True)
    var = jnp.mean(jnp.square(x - mean), axis=-1, keepdims=True)
    y = (x - mean) * lax.rsqrt(var + 1e-5) * params["gamma"] + params["beta"]
    out = y @ params["w_pred"] + params["b_pred"]
    return out, jnp.stack(new_state, axis=0)


# -----------------------------------------------------------------------------
# Deterministic parameter init (synthetic; shapes follow the module __init__)
# -----------------------------------------------------------------------------
def init_params(key, aud_dim, lxm_dim, hidden_dim, out_dim, depth):
    in_dim = aud_dim + lxm_dim
    gru_in0 = in_dim + hidden_dim
    params = {}

    def nrm(key, shape, scale=0.1):
        return scale * jax.random.normal(key, shape, dtype=jnp.float32)

    keys = iter(jax.random.split(key, 64))
    # embed_in  (stored transposed: [in, out])
    params["w_in"] = nrm(next(keys), (in_dim, hidden_dim))
    params["b_in"] = nrm(next(keys), (1, hidden_dim))
    # GRU layers (PyTorch weight_ih_l{l} is [3H, in]; we store transposed [in, 3H])
    for l in range(depth):
        lin = gru_in0 if l == 0 else hidden_dim
        params[f"wih_{l}"] = nrm(next(keys), (lin, 3 * hidden_dim))
        params[f"whh_{l}"] = nrm(next(keys), (hidden_dim, 3 * hidden_dim))
        params[f"bih_{l}"] = nrm(next(keys), (1, 3 * hidden_dim))
        params[f"bhh_{l}"] = nrm(next(keys), (1, 3 * hidden_dim))
    # LayerNorm (non-trivial affine so the fold-into-pred-head path is exercised)
    params["gamma"] = 1.0 + nrm(next(keys), (1, hidden_dim), scale=0.2)
    params["beta"] = nrm(next(keys), (1, hidden_dim), scale=0.2)
    # embed_pred
    params["w_pred"] = nrm(next(keys), (hidden_dim, out_dim))
    params["b_pred"] = nrm(next(keys), (1, out_dim))
    return params


# -----------------------------------------------------------------------------
if __name__ == "__main__":
    AUD_DIM, LXM_DIM, HIDDEN, OUT_DIM, DEPTH = 16, 16, 32, 24, 2
    N = 8

    key = jax.random.PRNGKey(0)
    k_aud, k_lxm, k_state, k_param = jax.random.split(key, 4)

    aud = jax.random.normal(k_aud, (N, AUD_DIM), dtype=jnp.float32)
    lxm = jax.random.normal(k_lxm, (N, LXM_DIM), dtype=jnp.float32)
    cell_state = jax.random.normal(k_state, (DEPTH, N, HIDDEN), dtype=jnp.float32)
    params = init_params(k_param, AUD_DIM, LXM_DIM, HIDDEN, OUT_DIM, DEPTH)

    # Compute the reference first: cell_state is donated into the kernel's state
    # output via input_output_aliases, so its buffer may be invalid afterwards.
    ref_out, ref_state = reference_forward(
        aud, lxm, cell_state, params, depth=DEPTH, hidden_dim=HIDDEN)
    jax.block_until_ready((ref_out, ref_state))

    out, new_state = gru_decoder_forward(
        aud, lxm, cell_state, params,
        depth=DEPTH, hidden_dim=HIDDEN, out_dim=OUT_DIM)
    jax.block_until_ready((out, new_state))

    assert out.shape == (N, OUT_DIM) and new_state.shape == (DEPTH, N, HIDDEN)
    assert jnp.allclose(out, ref_out, atol=2e-3, rtol=2e-3)
    assert jnp.allclose(new_state, ref_state, atol=2e-3, rtol=2e-3)

    print("KERNEL_OK")
</pallas_src>

<mosaic_0001>
module attributes {stable_mosaic.version = 11 : i64} {
  func.func @kernel(%arg0: memref<8x32xf32, #tpu.memory_space<vmem>>, %arg1: memref<2x8x32xf32, #tpu.memory_space<vmem>>, %arg2: memref<32x32xf32, #tpu.memory_space<vmem>>, %arg3: memref<2x96x96xf32, #tpu.memory_space<vmem>>, %arg4: memref<2x32x32xf32, #tpu.memory_space<vmem>>, %arg5: memref<9x32xf32, #tpu.memory_space<vmem>>, %arg6: memref<32x24xf32, #tpu.memory_space<vmem>>, %arg7: memref<1x24xf32, #tpu.memory_space<vmem>>, %arg8: memref<8x24xf32, #tpu.memory_space<vmem>>, %arg9: memref<2x8x32xf32, #tpu.memory_space<vmem>>) attributes {dimension_semantics = [], scalar_prefetch = 0 : i64, scratch_operands = 0 : i64, tpu.core_type = #tpu.core_type<tc>} {
    %c0 = arith.constant 0 : index
    %c0_0 = arith.constant 0 : index
    %0 = vector.load %arg0[%c0, %c0_0] : memref<8x32xf32, #tpu.memory_space<vmem>>, vector<8x32xf32>
    %c0_1 = arith.constant 0 : index
    %c0_2 = arith.constant 0 : index
    %1 = vector.load %arg5[%c0_1, %c0_2] : memref<9x32xf32, #tpu.memory_space<vmem>>, vector<9x32xf32>
    %c0_3 = arith.constant 0 : index
    %c0_4 = arith.constant 0 : index
    %2 = vector.load %arg2[%c0_3, %c0_4] : memref<32x32xf32, #tpu.memory_space<vmem>>, vector<32x32xf32>
    %cst = arith.constant dense<0.000000e+00> : vector<8x32xf32>
    %3 = tpu.matmul %0, %2, %cst {dimension_numbers = #tpu.dot_dimension_numbers<[1], [0], [0], [1], [0, 0, 1, 1], [], []>} : vector<8x32xf32>, vector<32x32xf32>, vector<8x32xf32> -> vector<8x32xf32>
    %4 = vector.extract_strided_slice %1 {offsets = [0, 0], sizes = [1, 32], strides = [1, 1]} : vector<9x32xf32> to vector<1x32xf32>
    %5 = vector.broadcast %4 : vector<1x32xf32> to vector<8x32xf32>
    %6 = arith.addf %3, %5 : vector<8x32xf32>
    %cst_5 = arith.constant 5.000000e-01 : f32
    %7 = vector.broadcast %cst_5 : f32 to vector<8x32xf32>
    %8 = arith.mulf %7, %6 : vector<8x32xf32>
    %cst_6 = arith.constant 0.707106769 : f32
    %9 = vector.broadcast %cst_6 : f32 to vector<8x32xf32>
    %10 = arith.mulf %6, %9 : vector<8x32xf32>
    %11 = math.erf %10 : vector<8x32xf32>
    %cst_7 = arith.constant 1.000000e+00 : f32
    %12 = vector.broadcast %cst_7 : f32 to vector<8x32xf32>
    %13 = arith.addf %12, %11 : vector<8x32xf32>
    %14 = arith.mulf %8, %13 : vector<8x32xf32>
    %15 = tpu.concatenate %14, %0 in 1 : vector<8x32xf32>, vector<8x32xf32> -> vector<8x64xf32>
    %c0_8 = arith.constant 0 : index
    %c0_9 = arith.constant 0 : index
    %c0_10 = arith.constant 0 : index
    %16 = vector.load %arg1[%c0_8, %c0_9, %c0_10] : memref<2x8x32xf32, #tpu.memory_space<vmem>>, vector<1x8x32xf32>
    %17 = vector.shape_cast %16 : vector<1x8x32xf32> to vector<8x32xf32>
    %18 = vector.extract_strided_slice %1 {offsets = [1, 0], sizes = [1, 32], strides = [1, 1]} : vector<9x32xf32> to vector<1x32xf32>
    %19 = vector.extract_strided_slice %1 {offsets = [2, 0], sizes = [1, 32], strides = [1, 1]} : vector<9x32xf32> to vector<1x32xf32>
    %20 = vector.extract_strided_slice %1 {offsets = [3, 0], sizes = [1, 32], strides = [1, 1]} : vector<9x32xf32> to vector<1x32xf32>
    %21 = vector.extract_strided_slice %1 {offsets = [4, 0], sizes = [1, 32], strides = [1, 1]} : vector<9x32xf32> to vector<1x32xf32>
    %22 = tpu.concatenate %15, %17 in 1 : vector<8x64xf32>, vector<8x32xf32> -> vector<8x96xf32>
    %c0_11 = arith.constant 0 : index
    %c0_12 = arith.constant 0 : index
    %c0_13 = arith.constant 0 : index
    %23 = vector.load %arg3[%c0_11, %c0_12, %c0_13] : memref<2x96x96xf32, #tpu.memory_space<vmem>>, vector<1x96x96xf32>
    %24 = vector.shape_cast %23 : vector<1x96x96xf32> to vector<96x96xf32>
    %cst_14 = arith.constant dense<0.000000e+00> : vector<8x96xf32>
    %25 = tpu.matmul %22, %24, %cst_14 {dimension_numbers = #tpu.dot_dimension_numbers<[1], [0], [0], [1], [0, 0, 1, 1], [], []>} : vector<8x96xf32>, vector<96x96xf32>, vector<8x96xf32> -> vector<8x96xf32>
    %c0_15 = arith.constant 0 : index
    %c0_16 = arith.constant 0 : index
    %c0_17 = arith.constant 0 : index
    %26 = vector.load %arg4[%c0_15, %c0_16, %c0_17] : memref<2x32x32xf32, #tpu.memory_space<vmem>>, vector<1x32x32xf32>
    %27 = vector.shape_cast %26 : vector<1x32x32xf32> to vector<32x32xf32>
    %cst_18 = arith.constant dense<0.000000e+00> : vector<8x32xf32>
    %28 = tpu.matmul %17, %27, %cst_18 {dimension_numbers = #tpu.dot_dimension_numbers<[1], [0], [0], [1], [0, 0, 1, 1], [], []>} : vector<8x32xf32>, vector<32x32xf32>, vector<8x32xf32> -> vector<8x32xf32>
    %29 = vector.extract_strided_slice %25 {offsets = [0, 0], sizes = [8, 32], strides = [1, 1]} : vector<8x96xf32> to vector<8x32xf32>
    %30 = vector.broadcast %18 : vector<1x32xf32> to vector<8x32xf32>
    %31 = arith.addf %29, %30 : vector<8x32xf32>
    %32 = arith.negf %31 : vector<8x32xf32>
    %33 = math.exp %32 : vector<8x32xf32>
    %cst_19 = arith.constant 1.000000e+00 : f32
    %34 = vector.broadcast %cst_19 : f32 to vector<8x32xf32>
    %35 = arith.addf %34, %33 : vector<8x32xf32>
    %36 = arith.divf %34, %35 : vector<8x32xf32>
    %37 = vector.extract_strided_slice %25 {offsets = [0, 32], sizes = [8, 32], strides = [1, 1]} : vector<8x96xf32> to vector<8x32xf32>
    %38 = vector.broadcast %19 : vector<1x32xf32> to vector<8x32xf32>
    %39 = arith.addf %37, %38 : vector<8x32xf32>
    %40 = arith.negf %39 : vector<8x32xf32>
    %41 = math.exp %40 : vector<8x32xf32>
    %cst_20 = arith.constant 1.000000e+00 : f32
    %42 = vector.broadcast %cst_20 : f32 to vector<8x32xf32>
    %43 = arith.addf %42, %41 : vector<8x32xf32>
    %44 = arith.divf %42, %43 : vector<8x32xf32>
    %45 = vector.extract_strided_slice %25 {offsets = [0, 64], sizes = [8, 32], strides = [1, 1]} : vector<8x96xf32> to vector<8x32xf32>
    %46 = vector.broadcast %20 : vector<1x32xf32> to vector<8x32xf32>
    %47 = arith.addf %45, %46 : vector<8x32xf32>
    %48 = vector.broadcast %21 : vector<1x32xf32> to vector<8x32xf32>
    %49 = arith.addf %28, %48 : vector<8x32xf32>
    %50 = arith.mulf %36, %49 : vector<8x32xf32>
    %51 = arith.addf %47, %50 : vector<8x32xf32>
    %52 = math.tanh %51 : vector<8x32xf32>
    %cst_21 = arith.constant 1.000000e+00 : f32
    %53 = vector.broadcast %cst_21 : f32 to vector<8x32xf32>
    %54 = arith.subf %53, %44 : vector<8x32xf32>
    %55 = arith.mulf %54, %52 : vector<8x32xf32>
    %56 = arith.mulf %44, %17 : vector<8x32xf32>
    %57 = arith.addf %55, %56 : vector<8x32xf32>
    %c0_22 = arith.constant 0 : index
    %c0_23 = arith.constant 0 : index
    %c0_24 = arith.constant 0 : index
    %58 = vector.load %arg9[%c0_22, %c0_23, %c0_24] : memref<2x8x32xf32, #tpu.memory_space<vmem>>, vector<1x8x32xf32>
    %59 = vector.shape_cast %58 : vector<1x8x32xf32> to vector<8x32xf32>
    %60 = vector.shape_cast %57 : vector<8x32xf32> to vector<1x8x32xf32>
    tpu.vector_store %arg9[%c0_22, %c0_23, %c0_24], %60 {strides = array<i32>} : memref<2x8x32xf32, #tpu.memory_space<vmem>>, vector<1x8x32xf32>,
    %c1 = arith.constant 1 : index
    %c0_25 = arith.constant 0 : index
    %c0_26 = arith.constant 0 : index
    %61 = vector.load %arg1[%c1, %c0_25, %c0_26] : memref<2x8x32xf32, #tpu.memory_space<vmem>>, vector<1x8x32xf32>
    %62 = vector.shape_cast %61 : vector<1x8x32xf32> to vector<8x32xf32>
    %63 = vector.extract_strided_slice %1 {offsets = [5, 0], sizes = [1, 32], strides = [1, 1]} : vector<9x32xf32> to vector<1x32xf32>
    %64 = vector.extract_strided_slice %1 {offsets = [6, 0], sizes = [1, 32], strides = [1, 1]} : vector<9x32xf32> to vector<1x32xf32>
    %65 = vector.extract_strided_slice %1 {offsets = [7, 0], sizes = [1, 32], strides = [1, 1]} : vector<9x32xf32> to vector<1x32xf32>
    %66 = vector.extract_strided_slice %1 {offsets = [8, 0], sizes = [1, 32], strides = [1, 1]} : vector<9x32xf32> to vector<1x32xf32>
    %67 = tpu.concatenate %57, %62 in 1 : vector<8x32xf32>, vector<8x32xf32> -> vector<8x64xf32>
    %c1_27 = arith.constant 1 : index
    %c0_28 = arith.constant 0 : index
    %c0_29 = arith.constant 0 : index
    %68 = vector.load %arg3[%c1_27, %c0_28, %c0_29] : memref<2x96x96xf32, #tpu.memory_space<vmem>>, vector<1x96x96xf32>
    %69 = vector.shape_cast %68 : vector<1x96x96xf32> to vector<96x96xf32>
    %70 = vector.extract_strided_slice %69 {offsets = [0, 0], sizes = [64, 96], strides = [1, 1]} : vector<96x96xf32> to vector<64x96xf32>
    %cst_30 = arith.constant dense<0.000000e+00> : vector<8x96xf32>
    %71 = tpu.matmul %67, %70, %cst_30 {dimension_numbers = #tpu.dot_dimension_numbers<[1], [0], [0], [1], [0, 0, 1, 1], [], []>} : vector<8x64xf32>, vector<64x96xf32>, vector<8x96xf32> -> vector<8x96xf32>
    %c1_31 = arith.constant 1 : index
    %c0_32 = arith.constant 0 : index
    %c0_33 = arith.constant 0 : index
    %72 = vector.load %arg4[%c1_31, %c0_32, %c0_33] : memref<2x32x32xf32, #tpu.memory_space<vmem>>, vector<1x32x32xf32>
    %73 = vector.shape_cast %72 : vector<1x32x32xf32> to vector<32x32xf32>
    %cst_34 = arith.constant dense<0.000000e+00> : vector<8x32xf32>
    %74 = tpu.matmul %62, %73, %cst_34 {dimension_numbers = #tpu.dot_dimension_numbers<[1], [0], [0], [1], [0, 0, 1, 1], [], []>} : vector<8x32xf32>, vector<32x32xf32>, vector<8x32xf32> -> vector<8x32xf32>
    %75 = vector.extract_strided_slice %71 {offsets = [0, 0], sizes = [8, 32], strides = [1, 1]} : vector<8x96xf32> to vector<8x32xf32>
    %76 = vector.broadcast %63 : vector<1x32xf32> to vector<8x32xf32>
    %77 = arith.addf %75, %76 : vector<8x32xf32>
    %78 = arith.negf %77 : vector<8x32xf32>
    %79 = math.exp %78 : vector<8x32xf32>
    %cst_35 = arith.constant 1.000000e+00 : f32
    %80 = vector.broadcast %cst_35 : f32 to vector<8x32xf32>
    %81 = arith.addf %80, %79 : vector<8x32xf32>
    %82 = arith.divf %80, %81 : vector<8x32xf32>
    %83 = vector.extract_strided_slice %71 {offsets = [0, 32], sizes = [8, 32], strides = [1, 1]} : vector<8x96xf32> to vector<8x32xf32>
    %84 = vector.broadcast %64 : vector<1x32xf32> to vector<8x32xf32>
    %85 = arith.addf %83, %84 : vector<8x32xf32>
    %86 = arith.negf %85 : vector<8x32xf32>
    %87 = math.exp %86 : vector<8x32xf32>
    %cst_36 = arith.constant 1.000000e+00 : f32
    %88 = vector.broadcast %cst_36 : f32 to vector<8x32xf32>
    %89 = arith.addf %88, %87 : vector<8x32xf32>
    %90 = arith.divf %88, %89 : vector<8x32xf32>
    %91 = vector.extract_strided_slice %71 {offsets = [0, 64], sizes = [8, 32], strides = [1, 1]} : vector<8x96xf32> to vector<8x32xf32>
    %92 = vector.broadcast %65 : vector<1x32xf32> to vector<8x32xf32>
    %93 = arith.addf %91, %92 : vector<8x32xf32>
    %94 = vector.broadcast %66 : vector<1x32xf32> to vector<8x32xf32>
    %95 = arith.addf %74, %94 : vector<8x32xf32>
    %96 = arith.mulf %82, %95 : vector<8x32xf32>
    %97 = arith.addf %93, %96 : vector<8x32xf32>
    %98 = math.tanh %97 : vector<8x32xf32>
    %cst_37 = arith.constant 1.000000e+00 : f32
    %99 = vector.broadcast %cst_37 : f32 to vector<8x32xf32>
    %100 = arith.subf %99, %90 : vector<8x32xf32>
    %101 = arith.mulf %100, %98 : vector<8x32xf32>
    %102 = arith.mulf %90, %62 : vector<8x32xf32>
    %103 = arith.addf %101, %102 : vector<8x32xf32>
    %c1_38 = arith.constant 1 : index
    %c0_39 = arith.constant 0 : index
    %c0_40 = arith.constant 0 : index
    %104 = vector.load %arg9[%c1_38, %c0_39, %c0_40] : memref<2x8x32xf32, #tpu.memory_space<vmem>>, vector<1x8x32xf32>
    %105 = vector.shape_cast %104 : vector<1x8x32xf32> to vector<8x32xf32>
    %106 = vector.shape_cast %103 : vector<8x32xf32> to vector<1x8x32xf32>
    tpu.vector_store %arg9[%c1_38, %c0_39, %c0_40], %106 {strides = array<i32>} : memref<2x8x32xf32, #tpu.memory_space<vmem>>, vector<1x8x32xf32>,
    %cst_41 = arith.constant dense<0.000000e+00> : vector<8xf32>
    %107 = vector.multi_reduction <add>, %103, %cst_41 [1] : vector<8x32xf32> to vector<8xf32>
    %108 = vector.shape_cast %107 : vector<8xf32> to vector<8x1xf32>
    %cst_42 = arith.constant 3.200000e+01 : f32
    %109 = vector.broadcast %cst_42 : f32 to vector<8x1xf32>
    %110 = arith.divf %108, %109 : vector<8x1xf32>
    %111 = vector.broadcast %110 : vector<8x1xf32> to vector<8x32xf32>
    %112 = arith.subf %103, %111 : vector<8x32xf32>
    %113 = arith.mulf %112, %112 : vector<8x32xf32>
    %cst_43 = arith.constant dense<0.000000e+00> : vector<8xf32>
    %114 = vector.multi_reduction <add>, %113, %cst_43 [1] : vector<8x32xf32> to vector<8xf32>
    %115 = vector.shape_cast %114 : vector<8xf32> to vector<8x1xf32>
    %cst_44 = arith.constant 3.200000e+01 : f32
    %116 = vector.broadcast %cst_44 : f32 to vector<8x1xf32>
    %117 = arith.divf %115, %116 : vector<8x1xf32>
    %118 = vector.broadcast %110 : vector<8x1xf32> to vector<8x32xf32>
    %119 = arith.subf %103, %118 : vector<8x32xf32>
    %cst_45 = arith.constant 9.99999974E-6 : f32
    %120 = vector.broadcast %cst_45 : f32 to vector<8x1xf32>
    %121 = arith.addf %117, %120 : vector<8x1xf32>
    %122 = math.rsqrt %121 : vector<8x1xf32>
    %123 = vector.broadcast %122 : vector<8x1xf32> to vector<8x32xf32>
    %124 = arith.mulf %119, %123 : vector<8x32xf32>
    %c0_46 = arith.constant 0 : index
    %c0_47 = arith.constant 0 : index
    %125 = vector.load %arg6[%c0_46, %c0_47] : memref<32x24xf32, #tpu.memory_space<vmem>>, vector<32x24xf32>
    %cst_48 = arith.constant dense<0.000000e+00> : vector<8x24xf32>
    %126 = tpu.matmul %124, %125, %cst_48 {dimension_numbers = #tpu.dot_dimension_numbers<[1], [0], [0], [1], [0, 0, 1, 1], [], []>} : vector<8x32xf32>, vector<32x24xf32>, vector<8x24xf32> -> vector<8x24xf32>
    %c0_49 = arith.constant 0 : index
    %c0_50 = arith.constant 0 : index
    %127 = vector.load %arg7[%c0_49, %c0_50] : memref<1x24xf32, #tpu.memory_space<vmem>>, vector<1x24xf32>
    %128 = vector.broadcast %127 : vector<1x24xf32> to vector<8x24xf32>
    %129 = arith.addf %126, %128 : vector<8x24xf32>
    %c0_51 = arith.constant 0 : index
    %c0_52 = arith.constant 0 : index
    %130 = vector.load %arg8[%c0_51, %c0_52] : memref<8x24xf32, #tpu.memory_space<vmem>>, vector<8x24xf32>
    tpu.vector_store %arg8[%c0_51, %c0_52], %129 {strides = array<i32>} : memref<8x24xf32, #tpu.memory_space<vmem>>, vector<8x24xf32>,
    return
  }
}

</mosaic_0001>

<bundles_post_ra>
// kernel: tpu_custom_call.1
= control target key start
LH: loop header
LB: loop body
LE: loop exit
PB: predicated region body
PF: predicated region fallthrough
CT: control target
= control target key end

     0   :  { %15 = vsyncpa [#allocation3], 0  ;;  %s1394_s0 = inlined_call_operand.vmem [shape: f32[8,32], index: 0, kind: input, shape index: {}]   ;;  %s1395_s1 = inlined_call_operand.hbm [shape: f32[2,8,32], index: 1, kind: input, shape index: {}, may-alias: {1,9}]   ;;  %s1396_s2 = inlined_call_operand.vmem [shape: f32[32,32], index: 2, kind: input, shape index: {}]   ;;  %s1397_s3 = inlined_call_operand.hbm [shape: f32[2,96,96], index: 3, kind: input, shape index: {}]   ;;  %s1398_s4 = inlined_call_operand.vmem [shape: f32[2,32,32], index: 4, kind: input, shape index: {}]   ;;  %s1399_s5 = inlined_call_operand.hbm [shape: f32[9,32], index: 5, kind: input, shape index: {}]   ;;  %s1400_s6 = inlined_call_operand.vmem [shape: f32[32,24], index: 6, kind: input, shape index: {}]   ;;  %s1401_s7 = inlined_call_operand.vmem [shape: f32[1,24], index: 7, kind: input, shape index: {}]   ;;  %s1402_s8 = inlined_call_operand.hbm [shape: f32[8,24], index: 8, kind: output, shape index: {0}]   ;;  %s1403_s9 = inlined_call_operand.hbm [shape: f32[2,8,32], index: 9, kind: output, shape index: {1}, may-alias: {1,9}]  }
   0x1   :  { %16 = vsyncpa [#allocation6], 0 }
   0x2   :  { %17 = vsyncpa [#allocation4], 0 }
   0x3   :  { %18 = vsyncpa [#allocation10], 0  ;;  %s1120_s30 = smov [#allocation5]   ;;  %s1121_s11 = smov [#allocation2]  }
   0x4   :  { %s40_s10 = sshll.u32 %s1120_s30, 4  ;;  %s26_s12 = sshll.u32 %s1121_s11, 4  ;;  %s41_s10 = int_to_ptr.vmem [resolvable:$true] %s40_s10  ;;  %s1183_s12 = int_to_ptr.vmem [resolvable:$true] %s26_s12 }
   0x5   :  { %s1002_s15 = scalar_lea.hbm %s1397_s3, 3072 }
   0x6   :  { %p1003_p0 = scmp.ne.s32.totalorder %s1397_s3, %s1002_s15  ;;  %p1006_p1 = scmp.lt.u32.totalorder %s1002_s15, %s1397_s3 }
   0x8   :  { %p1008_p2 = pnand %p1006_p1, %p1003_p0 }
   0xa   :  { %1011 = shalt.err (!%p1008_p2)
}
   0xb   :  { %s1012_s20 = scalar_lea.vmem %s41_s10, 3072  ;;  %p1017_p4 = scmp.lt.s32.totalorder %s41_s10, %s41_s10 }
   0xc   :  { %p1013_p3 = scmp.ne.s32.totalorder %s41_s10, %s1012_s20  ;;  %p1018_p5 = scmp.lt.s32.totalorder %s1012_s20, %s1012_s20 }
   0xe   :  { %p1019_p6 = por %p1018_p5, %p1017_p4 }
  0x10   :  { %p1020_p7 = pnand %p1019_p6, %p1013_p3 }
  0x12   :  { %1023 = shalt.err (!%p1020_p7)
}
  0x13   :  { %s1122_s21 = smov 128   ;;  %s1123_s22 = smov 8  }
  0x14   :  { %46 = dma.hbm_to_vmem [thread:$0]  %s1397_s3, 3072, %s41_s10, [#allocation6], %s1122_s21, %s1122_s21, %s1123_s22  }
  0x15   :  { %s1024_s27 = scalar_lea.hbm %s1395_s1, 256 }
  0x16   :  { %p1025_p8 = scmp.ne.s32.totalorder %s1395_s1, %s1024_s27  ;;  %p1028_p9 = scmp.lt.u32.totalorder %s1024_s27, %s1395_s1 }
  0x18   :  { %p1030_p10 = pnand %p1028_p9, %p1025_p8 }
  0x1a   :  { %1033 = shalt.err (!%p1030_p10)
}
  0x1b   :  { %s1034_s13 = scalar_lea.vmem %s1183_s12, 256  ;;  %p1039_p12 = scmp.lt.s32.totalorder %s1183_s12, %s1183_s12 }
  0x1c   :  { %p1035_p11 = scmp.ne.s32.totalorder %s1183_s12, %s1034_s13  ;;  %p1040_p13 = scmp.lt.s32.totalorder %s1034_s13, %s1034_s13 }
  0x1e   :  { %p1041_p0 = por %p1040_p13, %p1039_p12 }
  0x20   :  { %p1042_p1 = pnand %p1041_p0, %p1035_p11 }
  0x22   :  { %1045 = shalt.err (!%p1042_p1)
}
  0x23   :  { %32 = dma.hbm_to_vmem [thread:$0]  %s1395_s1, 256, %s1183_s12, [#allocation3], %s1122_s21, %s1122_s21, %s1123_s22  }
  0x24   :  { %s1124_s14 = smov [#allocation7]   ;;  %s1046_s18 = scalar_lea.hbm %s1399_s5, 256 }
  0x25   :  { %s54_s15 = sshll.u32 %s1124_s14, 4  ;;  %p1047_p2 = scmp.ne.s32.totalorder %s1399_s5, %s1046_s18  ;;  %s55_s15 = int_to_ptr.vmem [resolvable:$true] %s54_s15 }
  0x26   :  { %p1050_p3 = scmp.lt.u32.totalorder %s1046_s18, %s1399_s5 }
  0x28   :  { %p1052_p4 = pnand %p1050_p3, %p1047_p2 }
  0x2a   :  { %1055 = shalt.err (!%p1052_p4)
}
  0x2b   :  { %s1056_s25 = scalar_lea.vmem %s55_s15, 256  ;;  %p1061_p6 = scmp.lt.s32.totalorder %s55_s15, %s55_s15 }
  0x2c   :  { %p1057_p5 = scmp.ne.s32.totalorder %s55_s15, %s1056_s25  ;;  %p1062_p7 = scmp.lt.s32.totalorder %s1056_s25, %s1056_s25 }
  0x2e   :  { %p1063_p8 = por %p1062_p7, %p1061_p6 }
  0x30   :  { %p1064_p9 = pnand %p1063_p8, %p1057_p5 }
  0x32   :  { %1067 = shalt.err (!%p1064_p9)
}
  0x33   :  { %60 = dma.hbm_to_vmem [thread:$0]  %s1399_s5, 256, %s55_s15, [#allocation6], %s1122_s21, %s1122_s21, %s1123_s22  }
  0x34   :  { %1112 = dma.done.wait [#allocation3], 256  }
  0x35   :  { %1113 = vsyncadd [#allocation3], 4294967040 }
  0x36   :  { %1114 = dma.done.wait [#allocation6], 3328  }
  0x37   :  { %1115 = vsyncadd [#allocation6], 4294963968  ;;  %v1125_v0 = vmov 0.0|0.0   ;;  %vm1126_vm0 = vmmov 0   ;;  %v1127_v1 = vmov 0.0   ;;  %v77_v2 = vld [vmem:[%s1396_s2] sm:$0xff]  ;;  %v81_v25 = vlaneseq }
  0x38   :  { %911 = vmatprep.subr.bf16.mxu0 %v1125_v0  ;;  %829 = vmatprep.mubr.msk.f32.mxu0 %vm1126_vm0, %v1127_v1  ;;  %v78_v3 = vld [vmem:[%s1396_s2 + $0x8] sm:$0xff]  ;;  %v79_v4 = vld [vmem:[%s1396_s2 + $0x10] sm:$0xff]  ;;  %v80_v6 = vld [vmem:[%s1396_s2 + $0x18] sm:$0xff]  ;;  %s1128_s14 = smov 32   ;;  %s1129_s15 = smov 64   ;;  %vm85_vm1 = vcmask 261120  }
  0x39   :  { %917 = vmatprep.subr.bf16.mxu1 %v1125_v0  ;;  %856 = vmatprep.mubr.msk.f32.mxu1 %vm1126_vm0, %v1127_v1  ;;  %v912_v5 = vpack.c.bf16 %v78_v3, %v77_v2  ;;  %v74_v7 = vld [vmem:[%s1394_s0] sm:$0xff]  ;;  %v175_v8 = vld [vmem:[#allocation5] sm:$0xff]  ;;  %v176_v9 = vld [vmem:[#allocation5 + $0x8] sm:$0xff]  ;;  %v915_v10 = vpack.c.bf16 %v80_v6, %v79_v4  ;;  %v1268_v29 = vshrl.u32 %v81_v25, 7  ;;  %vm173_vm2 = vcmask 523264   ;;  %s1130_s24 = smov 96  }
  0x3a   :  { %164 = vrot.lane.b32.xlu0 %v74_v7, %s1128_s14  ;;  %v168_v11 = vld [vmem:[#allocation2] sm:$0xff]  ;;  %v918_v12 = vpack.c.bf16 %v176_v9, %v175_v8  ;;  %v178_v14 = vld [vmem:[#allocation5 + $0x18] sm:$0xff]  ;;  %v179_v16 = vld [vmem:[#allocation5 + $0x20] sm:$0xff]  ;;  %vm187_vm3 = vcmask 785408   ;;  %s1131_s0 = smov [#allocation9]  }
  0x3b   :  { %913 = vmatpush3.bf16.msra.mxu0 %v912_v5  ;;  %v177_v13 = vld [vmem:[#allocation5 + $0x10] sm:$0xff]  ;;  %v180_v17 = vld [vmem:[#allocation5 + $0x28] sm:$0xff]  ;;  %v182_v20 = vld [vmem:[#allocation5 + $0x38] sm:$0xff]  ;;  %v293_v33 = vsub.s32 3, %v1268_v29  ;;  %v278_v34 = vsub.s32 2, %v1268_v29  ;;  %v83_v41 = vsub.s32 0, %v1268_v29 }
  0x3c   :  { %914 = vmatprep.subr.bf16.mxu0 %v1125_v0  ;;  %919 = vmatpush3.bf16.msra.mxu1 %v918_v12  ;;  %v921_v15 = vpack.c.bf16 %v178_v14, %v177_v13  ;;  %v924_v18 = vpack.c.bf16 %v180_v17, %v179_v16  ;;  %v181_v19 = vld [vmem:[#allocation5 + $0x30] sm:$0xff]  ;;  %v183_v22 = vld [vmem:[#allocation5 + $0x40] sm:$0xff]  ;;  %v184_v23 = vld [vmem:[#allocation5 + $0x48] sm:$0xff]  ;;  %v267_v57 = vsub.s32 1, %v1268_v29  ;;  %v302_v3 = vsub.s32 4, %v1268_v29  ;;  %s746_s2 = sshll.u32 %s1131_s0, 4  ;;  %s747_s2 = int_to_ptr.vmem [resolvable:$true] %s746_s2 }
  0x3d   :  { %920 = vmatprep.subr.bf16.mxu1 %v1125_v0  ;;  %v927_v21 = vpack.c.bf16 %v182_v20, %v181_v19  ;;  %v930_v24 = vpack.c.bf16 %v184_v23, %v183_v22  ;;  %v185_v26 = vld [vmem:[#allocation5 + $0x50] sm:$0xff]  ;;  %v186_v27 = vld [vmem:[#allocation5 + $0x58] sm:$0xff]  ;;  %v263_v32 = vld [vmem:[%s1398_s4 + $0x10] sm:$0xff]  ;;  %p1073_p11 = scmp.lt.s32.totalorder %s747_s2, %s747_s2 }
  0x3e   :  { %170 = vrot.lane.b32.xlu0 %v168_v11, %s1129_s15  ;;  %v933_v28 = vpack.c.bf16 %v186_v27, %v185_v26  ;;  %v261_v30 = vld [vmem:[%s1398_s4] sm:$0xff]  ;;  %v262_v31 = vld [vmem:[%s1398_s4 + $0x8] sm:$0xff]  ;;  %v1282_v35 = vld [vmem:[#allocation7] sm:$0xff] }
  0x3f   :  { %916 = vmatpush3.bf16.msra.mxu0 %v915_v10  ;;  %v936_v36 = vpack.c.bf16 %v262_v31, %v261_v30  ;;  %v264_v37 = vld [vmem:[%s1398_s4 + $0x18] sm:$0xff]  ;;  %v294_v38 = vrot.slane %v1282_v35, %v293_v33  ;;  %v279_v39 = vrot.slane %v1282_v35, %v278_v34  ;;  %v84_v42 = vrot.slane %v1282_v35, %v83_v41  ;;  %v400_v12 = vld [vmem:[#allocation2 + $0x8] sm:$0xff]  ;;  %v407_v13 = vld [vmem:[#allocation5 + $0x60] sm:$0xff] }
  0x40   :  { %935 = vmatprep.subr.bf16.mxu0 %v1125_v0  ;;  %922 = vmatpush3.bf16.msra.mxu1 %v921_v15  ;;  %v939_v40 = vpack.c.bf16 %v264_v37, %v263_v32  ;;  %v268_v58 = vrot.slane %v1282_v35, %v267_v57  ;;  %v303_v4 = vrot.slane %v1282_v35, %v302_v3  ;;  %v408_v14 = vld [vmem:[#allocation5 + $0x68] sm:$0xff]  ;;  %v409_v15 = vld [vmem:[#allocation5 + $0x70] sm:$0xff]  ;;  %v410_v17 = vld [vmem:[#allocation5 + $0x78] sm:$0xff] }
  0x41   :  { %923 = vmatprep.subr.bf16.mxu1 %v1125_v0  ;;  %296 = vrot.lane.b32.xlu1 %v294_v38, %s1129_s15  ;;  %v942_v16 = vpack.c.bf16 %v408_v14, %v407_v13  ;;  %v411_v19 = vld [vmem:[#allocation5 + $0x80] sm:$0xff]  ;;  %v412_v20 = vld [vmem:[#allocation5 + $0x88] sm:$0xff]  ;;  %v413_v23 = vld [vmem:[#allocation5 + $0x90] sm:$0xff] }
  0x42   :  { %830 = vmatmul.mubr.msk.f32.vlgmr.msra.gmra.mrb[0].mxu0 %vm85_vm1, %v74_v7  ;;  %281 = vrot.lane.b32.xlu0 %v279_v39, %s1128_s14  ;;  %v769_v32 = vld [vmem:[%s1398_s4 + $0x20] sm:$0xff]  ;;  %v770_v33 = vld [vmem:[%s1398_s4 + $0x28] sm:$0xff]  ;;  %v771_v34 = vld [vmem:[%s1398_s4 + $0x30] sm:$0xff] }
  0x43   :  { %867 = vmatprep.mubr.msk.f32.mxu0 %vm1126_vm0, %v1127_v1  ;;  %937 = vmatpush3.bf16.msra.mxu0 %v936_v36  ;;  %v954_v36 = vpack.c.bf16 %v770_v33, %v769_v32  ;;  %v772_v37 = vld [vmem:[%s1398_s4 + $0x38] sm:$0xff] }
  0x44   :  { %925 = vmatpush3.bf16.msra.mxu1 %v924_v18  ;;  %938 = vmatprep.subr.bf16.mxu0 %v1125_v0  ;;  %v945_v18 = vpack.c.bf16 %v410_v17, %v409_v15  ;;  %v957_v39 = vpack.c.bf16 %v772_v37, %v771_v34 }
  0x45   :  { %926 = vmatprep.subr.bf16.mxu1 %v1125_v0 }
  0x46   :  { %389 = vrot.lane.b32.xlu0 %v168_v11, %s1128_s14 }
  0x47   :  { %940 = vmatpush3.bf16.msra.mxu0 %v939_v40 }
  0x48   :  { %928 = vmatpush3.bf16.msra.mxu1 %v927_v21  ;;  %941 = vmatprep.subr.bf16.mxu0 %v1125_v0  ;;  %v948_v21 = vpack.c.bf16 %v412_v20, %v411_v19 }
  0x49   :  { %929 = vmatprep.subr.bf16.mxu1 %v1125_v0 }
  0x4a   :  { %868 = vmatmul.mubr.msk.f32.vlgmr.msra.gmra.mrb[2].mxu0 %vm85_vm1, %v168_v11  ;;  %402 = vrot.lane.b32.xlu0 %v400_v12, %s1128_s14 }
  0x4b   :  { %886 = vmatprep.mubr.msk.f32.mxu0 %vm1126_vm0, %v1127_v1  ;;  %943 = vmatpush3.bf16.msra.mxu0 %v942_v16 }
  0x4c   :  { %931 = vmatpush3.bf16.msra.mxu1 %v930_v24  ;;  %944 = vmatprep.subr.bf16.mxu0 %v1125_v0  ;;  %v414_v24 = vld [vmem:[#allocation5 + $0x98] sm:$0xff] }
  0x4d   :  { %932 = vmatprep.subr.bf16.mxu1 %v1125_v0  ;;  %v951_v25 = vpack.c.bf16 %v414_v24, %v413_v23 }
  0x4f   :  { %946 = vmatpush3.bf16.msra.mxu0 %v945_v18 }
  0x50   :  { %934 = vmatpush3.bf16.msra.mxu1 %v933_v28  ;;  %947 = vmatprep.subr.bf16.mxu0 %v1125_v0 }
  0x51   :  { %953 = vmatprep.subr.bf16.mxu1 %v1125_v0 }
  0x53   :  { %949 = vmatpush3.bf16.msra.mxu0 %v948_v21 }
  0x54   :  { %950 = vmatprep.subr.bf16.mxu0 %v1125_v0 }
  0x57   :  { %952 = vmatpush3.bf16.msra.mxu0 %v951_v25 }
  0x58   :  { %959 = vmatprep.subr.bf16.mxu0 %v1125_v0 }
  0xac   :  { %v165_v47 = vpop.permute.xlu0 %164 }
  0xb0   :  { %v171_v52 = vpop.permute.xlu0 %170 }
  0xb3   :  { %v297_v8 = vpop.permute.xlu1 %296 }
  0xb4   :  { %v282_v26 = vpop.permute.xlu0 %281 }
  0xb8   :  { %v390_v40 = vpop.permute.xlu0 %389 }
 0x115   :  { %v155_v43 = vpop.f32.mrb[0].mxu0 }
 0x116   :  { %v156_v44 = vadd.f32 %v155_v43, %v84_v42  ;;  %v831_v45 = vpop.f32.mrb[1].mxu0 }
 0x117   :  { %v521_v45 = vsub.s32 7, %v1268_v29 }
 0x118   :  { %v160_v46 = vmul.f32 0.70710677, %v156_v44  ;;  %v159_v49 = vmul.f32 0.5, %v156_v44 }
 0x11a   :  { %978 = verf.f32 %v160_v46 }
 0x11d   :  { %v372_v55 = vpop.f32.mrb[2].mxu0 }
 0x11e   :  { %v869_v56 = vpop.f32.mrb[3].mxu0  ;;  %v373_v5 = vadd.f32 %v372_v55, %v303_v4  ;;  %v495_v55 = vsub.s32 5, %v1268_v29 }
 0x120   :  { %v496_v56 = vrot.slane %v1282_v35, %v495_v55 }
 0x124   :  { %v979_v48 = vpop.eup %978 }
 0x125   :  { %v162_v50 = vadd.f32 1.0, %v979_v48  ;;  %v506_v48 = vsub.s32 6, %v1268_v29 }
 0x127   :  { %v163_v51 = vmul.f32 %v162_v50, %v159_v49  ;;  %v507_v49 = vrot.slane %v1282_v35, %v506_v48  ;;  %v403_v50 = vpop.permute.xlu0 %402 }
 0x129   :  { %v167_v53 = vsel %vm85_vm1, %v163_v51, %v165_v47  ;;  %v522_v47 = vrot.slane %v1282_v35, %v521_v45 }
 0x12a   :  { %v174_v54 = vsel %vm173_vm2, %v167_v53, %v171_v52 }
 0x12b   :  { %857 = vmatmul.mubr.msk.f32.vlgmr.msra.gmra.mrb[0].mxu1 %vm187_vm3, %v174_v54 }
 0x12c   :  { %897 = vmatprep.mubr.msk.f32.mxu1 %vm1126_vm0, %v1127_v1  ;;  %955 = vmatpush3.bf16.msra.mxu1 %v954_v36 }
 0x12d   :  { %956 = vmatprep.subr.bf16.mxu1 %v1125_v0 }
 0x130   :  { %958 = vmatpush3.bf16.msra.mxu1 %v957_v39 }
 0x133   :  { %898 = vmatmul.mubr.msk.f32.vlgmr.msra.gmra.mrb[2].mxu1 %vm85_vm1, %v400_v12 }
 0x1fe   :  { %v257_v59 = vpop.f32.mrb[0].mxu1 }
 0x1ff   :  { %v269_v60 = vadd.f32 %v268_v58, %v257_v59  ;;  %v858_v61 = vpop.f32.mrb[1].mxu1  ;;  %v299_v9 = vadd.f32 %v297_v8, %v257_v59  ;;  %v284_v27 = vadd.f32 %v282_v26, %v257_v59  ;;  %v643_v26 = vld [vmem:[%s1400_s6] sm:$0xff] }
 0x201   :  { %v765_v62 = vmul.f32 -1.442695, %v269_v60  ;;  %v766_v28 = vmul.f32 -1.442695, %v284_v27  ;;  %v644_v27 = vld [vmem:[%s1400_s6 + $0x8] sm:$0xff] }
 0x203   :  { %980 = vpow2.f32 %v765_v62 }
 0x206   :  { %v600_v53 = vpop.f32.mrb[2].mxu1 }
 0x207   :  { %v899_v54 = vpop.f32.mrb[3].mxu1 }
 0x20d   :  { %v981_v63 = vpop.eup %980 }
 0x20e   :  { %v273_v2 = vadd.f32 1.0, %v981_v63  ;;  %v775_v63 = vld [vmem:[#allocation7 + $0x8] ss:$0 sm:$0xff] }
 0x210   :  { %982 = vrcp.f32 %v273_v2  ;;  %v601_v2 = vadd.f32 %v775_v63, %v600_v53 }
 0x21a   :  { %v983_v6 = vpop.eup %982 }
 0x21b   :  { %v376_v7 = vmul.f32 %v983_v6, %v373_v5 }
 0x21d   :  { %378 = vrot.lane.b32.xlu1 %v376_v7, %s1129_s15 }
 0x28f   :  { %v379_v10 = vpop.permute.xlu1 %378 }
 0x290   :  { %v381_v11 = vadd.f32 %v379_v10, %v299_v9 }
 0x292   :  { %984 = vtanh.f32 %v381_v11 }
 0x293   :  { %986 = vpow2.f32 %v766_v28  ;;  %v645_v28 = vld [vmem:[%s1400_s6 + $0x10] sm:$0xff] }
 0x29c   :  { %v985_v22 = vpop.eup %984 }
 0x29d   :  { %385 = vrot.lane.b32.xlu1 %v985_v22, %s1130_s24  ;;  %v987_v30 = vpop.eup %986 }
 0x29e   :  { %v288_v31 = vadd.f32 1.0, %v987_v30  ;;  %v960_v30 = vpack.c.bf16 %v644_v27, %v643_v26 }
 0x2a0   :  { %988 = vrcp.f32 %v288_v31  ;;  %v646_v31 = vld [vmem:[%s1400_s6 + $0x18] sm:$0xff]  ;;  %s1068_s6 = scalar_lea.vmem %s747_s2, 256 }
 0x2a1   :  { %v963_v32 = vpack.c.bf16 %v646_v31, %v645_v28  ;;  %p1069_p10 = scmp.ne.s32.totalorder %s747_s2, %s1068_s6  ;;  %p1074_p12 = scmp.lt.s32.totalorder %s1068_s6, %s1068_s6 }
 0x2a3   :  { %p1075_p13 = por %p1074_p12, %p1073_p11 }
 0x2a5   :  { %p1076_p0 = pnand %p1075_p13, %p1069_p10 }
 0x2aa   :  { %v989_v38 = vpop.eup %988 }
 0x2ab   :  { %v383_v41 = vsub.f32 1.0, %v989_v38  ;;  %v392_v43 = vmul.f32 %v989_v38, %v390_v40 }
 0x30f   :  { %v386_v42 = vpop.permute.xlu1 %385 }
 0x310   :  { %v388_v44 = vmul.f32 %v386_v42, %v383_v41 }
 0x312   :  { %v393_v46 = vadd.f32 %v392_v43, %v388_v44 }
 0x314   :  { %395 = vrot.lane.b32.xlu1 %v393_v46, %s1130_s24 }
 0x318   :  { %524 = vrot.lane.b32.xlu1 %v522_v47, %s1129_s15 }
 0x31c   :  { %509 = vrot.lane.b32.xlu1 %v507_v49, %s1128_s14 }
 0x386   :  { %v396_v51 = vpop.permute.xlu1 %395 }
 0x387   :  { %398 = vst.msk [vmem:[#allocation9] sm:$0xff] %vm85_vm1, %v396_v51  ;;  %v405_v52 = vsel %vm85_vm1, %v396_v51, %v403_v50 }
 0x388   :  { %887 = vmatmul.mubr.msk.f32.vlgmr.msra.gmra.mrb[4].mxu0 %vm173_vm2, %v405_v52 }
 0x389   :  { %908 = vmatprep.mubr.msk.f32.mxu0 %vm1126_vm0, %v1127_v1  ;;  %961 = vmatpush3.bf16.msra.mxu0 %v960_v30 }
 0x38a   :  { %v525_v1 = vpop.permute.xlu1 %524  ;;  %962 = vmatprep.subr.bf16.mxu0 %v1125_v0 }
 0x38d   :  { %964 = vmatpush3.bf16.msra.mxu0 %v963_v32 }
 0x38e   :  { %v510_v7 = vpop.permute.xlu1 %509 }
 0x45b   :  { %v484_v57 = vpop.f32.mrb[4].mxu0 }
 0x45c   :  { %v497_v58 = vadd.f32 %v496_v56, %v484_v57  ;;  %v888_v59 = vpop.f32.mrb[5].mxu0  ;;  %v527_v5 = vadd.f32 %v525_v1, %v484_v57  ;;  %v512_v8 = vadd.f32 %v510_v7, %v484_v57 }
 0x45e   :  { %v773_v60 = vmul.f32 -1.442695, %v497_v58  ;;  %v774_v9 = vmul.f32 -1.442695, %v512_v8 }
 0x460   :  { %990 = vpow2.f32 %v773_v60 }
 0x46a   :  { %v991_v61 = vpop.eup %990 }
 0x46b   :  { %v501_v62 = vadd.f32 1.0, %v991_v61 }
 0x46d   :  { %992 = vrcp.f32 %v501_v62 }
 0x477   :  { %v993_v3 = vpop.eup %992 }
 0x478   :  { %v604_v4 = vmul.f32 %v993_v3, %v601_v2 }
 0x47a   :  { %606 = vrot.lane.b32.xlu0 %v604_v4, %s1129_s15 }
 0x4ec   :  { %v607_v6 = vpop.permute.xlu0 %606 }
 0x4ed   :  { %v609_v29 = vadd.f32 %v607_v6, %v527_v5 }
 0x4ef   :  { %994 = vtanh.f32 %v609_v29 }
 0x4f0   :  { %996 = vpow2.f32 %v774_v9 }
 0x4f9   :  { %v995_v35 = vpop.eup %994 }
 0x4fa   :  { %613 = vrot.lane.b32.xlu0 %v995_v35, %s1130_s24  ;;  %v997_v10 = vpop.eup %996 }
 0x4fb   :  { %v516_v11 = vadd.f32 1.0, %v997_v10 }
 0x4fd   :  { %998 = vrcp.f32 %v516_v11 }
 0x507   :  { %v999_v12 = vpop.eup %998 }
 0x508   :  { %v611_v13 = vsub.f32 1.0, %v999_v12  ;;  %v617_v15 = vmul.f32 %v999_v12, %v403_v50 }
 0x56c   :  { %v614_v14 = vpop.permute.xlu0 %613 }
 0x56d   :  { %v616_v16 = vmul.f32 %v614_v14, %v611_v13 }
 0x56f   :  { %v618_v17 = vadd.f32 %v617_v15, %v616_v16 }
 0x571   :  { %620 = vrot.lane.b32.xlu1 %v618_v17, %s1130_s24 }
 0x5e3   :  { %v621_v18 = vpop.permute.xlu1 %620 }
 0x5e4   :  { %624 = vst.msk [vmem:[#allocation9 + $0x8] sm:$0xff] %vm85_vm1, %v621_v18  ;;  %v625_v19 = vsel %vm85_vm1, %v621_v18, 0.0 }
 0x5e5   :  { %626 = vadd.xlane.f32.xlu0 %v625_v19 }
 0x672   :  { %v627_v20 = vpop.xlane.xlu0 %626 }
 0x673   :  { %v629_v21 = vmul.f32 0.03125, %v627_v20 }
 0x675   :  { %v630_v22 = vsub.f32 %v618_v17, %v629_v21 }
 0x677   :  { %v631_v23 = vmul.f32 %v630_v22, %v630_v22 }
 0x679   :  { %633 = vrot.lane.b32.xlu1 %v631_v23, %s1130_s24 }
 0x6eb   :  { %v634_v24 = vpop.permute.xlu1 %633 }
 0x6ec   :  { %v636_v25 = vsel %vm85_vm1, %v634_v24, 0.0 }
 0x6ed   :  { %637 = vadd.xlane.f32.xlu1 %v636_v25 }
 0x77a   :  { %v638_v33 = vpop.xlane.xlu1 %637 }
 0x77b   :  { %v639_v34 = vmul.f32 0.03125, %v638_v33 }
 0x77d   :  { %v640_v36 = vadd.f32 1e-05, %v639_v34 }
 0x77f   :  { %1000 = vrsqrt.f32 %v640_v36 }
 0x789   :  { %v1001_v37 = vpop.eup %1000 }
 0x78a   :  { %v642_v38 = vmul.f32 %v1001_v37, %v630_v22 }
 0x78c   :  { %655 = vrot.lane.b32.xlu0 %v642_v38, %s1130_s24 }
 0x7fe   :  { %v656_v39 = vpop.permute.xlu0 %655 }
 0x7ff   :  { %909 = vmatmul.mubr.msk.f32.vlgmr.msra.gmra.mrb[6].mxu0 %vm85_vm1, %v656_v39 }
 0x800   :  { %1079 = shalt.err (!%p1076_p0)
}
 0x801   :  { %s1080_s18 = scalar_lea.hbm %s1403_s9, 256 }
 0x802   :  { %p1081_p1 = scmp.ne.s32.totalorder %s1403_s9, %s1080_s18  ;;  %p1084_p2 = scmp.lt.u32.totalorder %s1080_s18, %s1403_s9 }
 0x804   :  { %p1086_p3 = pnand %p1084_p2, %p1081_p1 }
 0x806   :  { %1089 = shalt.err (!%p1086_p3)
}
 0x807   :  { %752 = dma.vmem_to_hbm [thread:$0]  %s747_s2, 256, %s1403_s9, [#allocation10], %s1122_s21, %s1122_s21, %s1123_s22   ;;  %vm729_vm4 = vcmask 195584  }
 0x808   :  { %v777_v0 = vld [vmem:[%s1401_s7] ss:$0 sm:$0xff]  ;;  %s1132_s27 = smov [#allocation8]  }
 0x809   :  { %s737_s5 = sshll.u32 %s1132_s27, 4  ;;  %s738_s5 = int_to_ptr.vmem [resolvable:$true] %s737_s5 }
 0x80a   :  { %s1090_s28 = scalar_lea.vmem %s738_s5, 128  ;;  %p1095_p5 = scmp.lt.s32.totalorder %s738_s5, %s738_s5 }
 0x80b   :  { %p1091_p4 = scmp.ne.s32.totalorder %s738_s5, %s1090_s28  ;;  %p1096_p6 = scmp.lt.s32.totalorder %s1090_s28, %s1090_s28 }
 0x80d   :  { %p1097_p7 = por %p1096_p6, %p1095_p5 }
 0x80f   :  { %p1098_p8 = pnand %p1097_p7, %p1091_p4 }
 0x8d2   :  { %v725_v40 = vpop.f32.mrb[6].mxu0 }
 0x8d3   :  { %v726_v41 = vadd.f32 %v777_v0, %v725_v40  ;;  %v910_v42 = vpop.f32.mrb[7].mxu0 }
 0x8d5   :  { %730 = vst.msk [vmem:[#allocation8] sm:$0xff] %vm729_vm4, %v726_v41 }
 0x8d6   :  { %1101 = shalt.err (!%p1098_p8)
}
 0x8d7   :  { %s1102_s22 = scalar_lea.hbm %s1402_s8, 128 }
 0x8d8   :  { %p1103_p9 = scmp.ne.s32.totalorder %s1402_s8, %s1102_s22  ;;  %p1106_p10 = scmp.lt.u32.totalorder %s1102_s22, %s1402_s8 }
 0x8da   :  { %p1108_p11 = pnand %p1106_p10, %p1103_p9 }
 0x8dc   :  { %1111 = shalt.err (!%p1108_p11)
}
 0x8dd   :  { %740 = dma.vmem_to_hbm [thread:$0]  %s738_s5, 128, %s1402_s8, [#allocation4]  }
 0x8de   :  { %1116 = dma.done.wait [#allocation4], 128  }
 0x8df   :  { %1117 = vsyncadd [#allocation4], 4294967168 }
 0x8e0   :  { %1118 = dma.done.wait [#allocation10], 256  }
 0x8e1   :  { %1119 = vsyncadd [#allocation10], 4294967040 }
 0x8e2   :  { %759 = vsyncpa [#allocation3], 1 }
 0x8e3   :  { %760 = vsyncpa [#allocation6], 1 }
 0x8e4   :  { %761 = vsyncpa [#allocation4], 1 }
 0x8e5   :  { %762 = vsyncpa [#allocation10], 1 }

</bundles_post_ra>
